<compile_context>
chip_gen: v7x
topology: tpu7x:2x2x1
jax: 0.10.0
libtpu: 0.0.40
codegen_flags: <defaults>
</compile_context>

<pallas_src>
from functools import partial

import jax
import jax.numpy as jnp
from jax.experimental import pallas as pl
from jax.experimental.pallas import tpu as pltpu


def _groupnorm_kernel(x_ref, gamma_ref, beta_ref, m_ref, mt_ref, o_ref, *, inv_gs, eps):
    """Processes one (block_rows, Cf) tile of (folded) rows.

    m_ref  : (Cf, Gf) static one-hot group-membership matrix (f32)
    mt_ref : (Gf, Cf) its transpose (passed separately to avoid an in-kernel transpose)
    Group sums / broadcast-back run on the MXU (full-f32 precision) -> no lane-splitting
    reshape and no XLU reduce over a sub-128-lane layout.
    """
    x = x_ref[...].astype(jnp.float32)        # (tm, Cf)
    m = m_ref[...]                            # (Cf, Gf)
    mt = mt_ref[...]                          # (Gf, Cf)

    hp = jax.lax.Precision.HIGHEST            # exact f32 MXU contraction

    # per-group mean, broadcast back to channels
    sums = jnp.dot(x, m, precision=hp, preferred_element_type=jnp.float32)          # (tm, Gf)
    mean_c = jnp.dot(sums * inv_gs, mt, precision=hp,
                     preferred_element_type=jnp.float32)                            # (tm, Cf)
    d = x - mean_c
    # per-group biased variance (matches torch.nn.GroupNorm), broadcast back
    ssq = jnp.dot(d * d, m, precision=hp, preferred_element_type=jnp.float32)       # (tm, Gf)
    rstd_c = jnp.dot(jax.lax.rsqrt(ssq * inv_gs + eps), mt, precision=hp,
                     preferred_element_type=jnp.float32)                            # (tm, Cf)

    y = d * rstd_c * gamma_ref[...].astype(jnp.float32) + beta_ref[...].astype(jnp.float32)
    o_ref[...] = y.astype(o_ref.dtype)


def _pick_block_rows(n_rows, Cf, itemsize, *, target=1024,
                     vmem_budget_bytes=32 * 1024 * 1024):
    """Largest sublane-aligned row tile that fits a conservative VMEM budget."""
    sub = 16 if itemsize < 4 else 8                      # sublane packing (bf16 vs f32)
    # double-buffered in+out tiles plus ~2 f32 working copies of the tile
    per_row_bytes = Cf * (4 * itemsize + 2 * 4)
    br = min(target, max(sub, vmem_budget_bytes // per_row_bytes))
    # keep several grid steps available so v7x's 2 TensorCores both get work
    if n_rows > 4 * sub:
        br = min(br, max(sub, n_rows // 4))
    br = max(sub, (br // sub) * sub)
    # no point exceeding the (padded) row count
    br = min(br, ((n_rows + sub - 1) // sub) * sub)
    return br


def group_norm(x, gamma, beta, *, num_groups, eps=1e-5, block_rows=None):
    """x: (B, T, C); gamma, beta: (C,). Returns (B, T, C). Matches nn.GroupNorm on x.view(B*T, C)."""
    B, T, C = x.shape
    assert C % num_groups == 0, "embed_dim must be divisible by num_groups"
    gs = C // num_groups
    N = B * T
    dtype = x.dtype
    itemsize = jnp.dtype(dtype).itemsize

    # Fold rows into the lane axis when C is narrow so loads/stores stay lane-dense.
    fold = max(1, 128 // C) if C < 128 else 1
    Cf = C * fold
    Gf = num_groups * fold

    n_rows = -(-N // fold)                                # folded row count (ceil)
    if block_rows is None:
        block_rows = _pick_block_rows(n_rows, Cf, itemsize)
    sub = 16 if itemsize < 4 else 8
    block_rows = max(sub, (block_rows // sub) * sub)

    # Pad rows so they divide fold * block_rows; padded (zero) rows normalize to finite
    # values (eps > 0) and are sliced off afterwards.
    rows_per_tile = fold * block_rows
    Np = -(-N // rows_per_tile) * rows_per_tile
    x2 = x.reshape(N, C)
    if Np != N:
        x2 = jnp.pad(x2, ((0, Np - N), (0, 0)))
    xf = x2.reshape(Np // fold, Cf)

    gamma_f = jnp.tile(gamma.reshape(-1), fold).reshape(1, Cf).astype(jnp.float32)
    beta_f = jnp.tile(beta.reshape(-1), fold).reshape(1, Cf).astype(jnp.float32)

    # Static one-hot membership: folded channel j belongs to group j // gs (block-diagonal
    # across folded rows, so groups never mix between original rows).
    grp = jnp.arange(Cf, dtype=jnp.int32) // gs
    m = (grp[:, None] == jnp.arange(Gf, dtype=jnp.int32)[None, :]).astype(jnp.float32)
    mt = jnp.transpose(m)

    grid = (Np // fold) // block_rows

    # Explicit scoped-VMEM budget: double-buffered in+out tiles + f32 working copies,
    # 2x headroom, capped at 48 MiB so it stays safe on v7x's 64 MiB physical VMEM.
    tile_io_bytes = 2 * 2 * block_rows * Cf * itemsize
    tile_f32_bytes = 2 * block_rows * Cf * 4
    vmem_limit = int(min(max(2 * (tile_io_bytes + tile_f32_bytes), 32 * 1024 * 1024),
                         48 * 1024 * 1024))

    kernel = partial(_groupnorm_kernel, inv_gs=1.0 / gs, eps=float(eps))

    out_f = pl.pallas_call(
        kernel,
        out_shape=jax.ShapeDtypeStruct((Np // fold, Cf), dtype),
        grid_spec=pltpu.PrefetchScalarGridSpec(
            num_scalar_prefetch=0,
            grid=(grid,),
            in_specs=[
                pl.BlockSpec((block_rows, Cf), lambda i: (i, 0)),
                pl.BlockSpec((1, Cf), lambda i: (0, 0)),
                pl.BlockSpec((1, Cf), lambda i: (0, 0)),
                pl.BlockSpec((Cf, Gf), lambda i: (0, 0)),
                pl.BlockSpec((Gf, Cf), lambda i: (0, 0)),
            ],
            out_specs=pl.BlockSpec((block_rows, Cf), lambda i: (i, 0)),
        ),
        compiler_params=pltpu.CompilerParams(
            dimension_semantics=("parallel",),
            vmem_limit_bytes=vmem_limit,
        ),
    )(xf, gamma_f, beta_f, m, mt)

    out2 = out_f.reshape(Np, C)[:N]
    return out2.reshape(B, T, C)


def group_norm_ref(x, gamma, beta, *, num_groups, eps=1e-5):
    B, T, C = x.shape
    gs = C // num_groups
    x2 = x.reshape(B * T, num_groups, gs).astype(jnp.float32)
    mean = jnp.mean(x2, axis=-1, keepdims=True)
    var = jnp.mean((x2 - mean) ** 2, axis=-1, keepdims=True)
    xn = ((x2 - mean) / jnp.sqrt(var + eps)).reshape(B * T, C)
    y = xn * gamma.astype(jnp.float32) + beta.astype(jnp.float32)
    return y.reshape(B, T, C).astype(x.dtype)


if __name__ == "__main__":
    key = jax.random.PRNGKey(0)

    # Case 1: matches the module's typical small shape (C < 128 -> lane folding path).
    B, T, C, G = 2, 8, 32, 4
    kx, kg, kb, key = jax.random.split(key, 4)
    x = jax.random.normal(kx, (B, T, C), dtype=jnp.float32)
    gamma = jnp.ones((C,), jnp.float32) + 0.1 * jax.random.normal(kg, (C,), jnp.float32)
    beta = 0.1 * jax.random.normal(kb, (C,), jnp.float32)

    out = group_norm(x, gamma, beta, num_groups=G, eps=1e-5)
    out = jax.block_until_ready(out)
    ref = group_norm_ref(x, gamma, beta, num_groups=G, eps=1e-5)
    assert out.shape == (B, T, C)
    assert jnp.allclose(out, ref, atol=2e-5, rtol=2e-5), "mismatch vs reference (case 1)"

    # Case 2: non-divisible row count (B*T = 21) exercising the padding path.
    B2, T2, C2, G2 = 3, 7, 64, 8
    kx2, kg2, kb2, key = jax.random.split(key, 4)
    x2 = jax.random.normal(kx2, (B2, T2, C2), dtype=jnp.float32)
    gamma2 = jnp.ones((C2,), jnp.float32) + 0.1 * jax.random.normal(kg2, (C2,), jnp.float32)
    beta2 = 0.1 * jax.random.normal(kb2, (C2,), jnp.float32)

    out2 = group_norm(x2, gamma2, beta2, num_groups=G2, eps=1e-5)
    out2 = jax.block_until_ready(out2)
    ref2 = group_norm_ref(x2, gamma2, beta2, num_groups=G2, eps=1e-5)
    assert out2.shape == (B2, T2, C2)
    assert jnp.allclose(out2, ref2, atol=2e-5, rtol=2e-5), "mismatch vs reference (case 2)"

    print("KERNEL_OK")
</pallas_src>

<mosaic_0001>
module attributes {stable_mosaic.version = 11 : i64} {
  func.func @_groupnorm_kernel(%arg0: i32, %arg1: memref<8x128xf32, #tpu.memory_space<vmem>>, %arg2: memref<1x128xf32, #tpu.memory_space<vmem>>, %arg3: memref<1x128xf32, #tpu.memory_space<vmem>>, %arg4: memref<128x16xf32, #tpu.memory_space<vmem>>, %arg5: memref<16x128xf32, #tpu.memory_space<vmem>>, %arg6: memref<8x128xf32, #tpu.memory_space<vmem>>) attributes {dimension_semantics = [#tpu.dimension_semantics<parallel>], iteration_bounds = array<i64: 1>, scalar_prefetch = 0 : i64, scratch_operands = 0 : i64, tpu.core_type = #tpu.core_type<tc>, window_params = [{transform_indices = @transform_0, window_bounds = array<i64: 8, 128>}, {pipeline_mode = #tpu.pipeline_mode<synchronous>, transform_indices = @transform_1, window_bounds = array<i64: 1, 128>}, {pipeline_mode = #tpu.pipeline_mode<synchronous>, transform_indices = @transform_2, window_bounds = array<i64: 1, 128>}, {pipeline_mode = #tpu.pipeline_mode<synchronous>, transform_indices = @transform_3, window_bounds = array<i64: 128, 16>}, {pipeline_mode = #tpu.pipeline_mode<synchronous>, transform_indices = @transform_4, window_bounds = array<i64: 16, 128>}, {transform_indices = @transform_5, window_bounds = array<i64: 8, 128>}]} {
    %c0 = arith.constant 0 : index
    %c0_0 = arith.constant 0 : index
    %0 = vector.load %arg1[%c0, %c0_0] : memref<8x128xf32, #tpu.memory_space<vmem>>, vector<8x128xf32>
    %c0_1 = arith.constant 0 : index
    %c0_2 = arith.constant 0 : index
    %1 = vector.load %arg4[%c0_1, %c0_2] : memref<128x16xf32, #tpu.memory_space<vmem>>, vector<128x16xf32>
    %c0_3 = arith.constant 0 : index
    %c0_4 = arith.constant 0 : index
    %2 = vector.load %arg5[%c0_3, %c0_4] : memref<16x128xf32, #tpu.memory_space<vmem>>, vector<16x128xf32>
    %cst = arith.constant dense<0.000000e+00> : vector<8x16xf32>
    %3 = tpu.matmul %0, %1, %cst {dimension_numbers = #tpu.dot_dimension_numbers<[1], [0], [0], [1], [0, 0, 1, 1], [], []>, precision = #tpu.contract_precision<fp32>} : vector<8x128xf32>, vector<128x16xf32>, vector<8x16xf32> -> vector<8x16xf32>
    %cst_5 = arith.constant 1.250000e-01 : f32
    %4 = vector.broadcast %cst_5 : f32 to vector<8x16xf32>
    %5 = arith.mulf %3, %4 : vector<8x16xf32>
    %cst_6 = arith.constant dense<0.000000e+00> : vector<8x128xf32>
    %6 = tpu.matmul %5, %2, %cst_6 {dimension_numbers = #tpu.dot_dimension_numbers<[1], [0], [0], [1], [0, 0, 1, 1], [], []>, precision = #tpu.contract_precision<fp32>} : vector<8x16xf32>, vector<16x128xf32>, vector<8x128xf32> -> vector<8x128xf32>
    %7 = arith.subf %0, %6 : vector<8x128xf32>
    %8 = arith.mulf %7, %7 : vector<8x128xf32>
    %cst_7 = arith.constant dense<0.000000e+00> : vector<8x16xf32>
    %9 = tpu.matmul %8, %1, %cst_7 {dimension_numbers = #tpu.dot_dimension_numbers<[1], [0], [0], [1], [0, 0, 1, 1], [], []>, precision = #tpu.contract_precision<fp32>} : vector<8x128xf32>, vector<128x16xf32>, vector<8x16xf32> -> vector<8x16xf32>
    %cst_8 = arith.constant 1.250000e-01 : f32
    %10 = vector.broadcast %cst_8 : f32 to vector<8x16xf32>
    %11 = arith.mulf %9, %10 : vector<8x16xf32>
    %cst_9 = arith.constant 9.99999974E-6 : f32
    %12 = vector.broadcast %cst_9 : f32 to vector<8x16xf32>
    %13 = arith.addf %11, %12 : vector<8x16xf32>
    %14 = math.rsqrt %13 : vector<8x16xf32>
    %cst_10 = arith.constant dense<0.000000e+00> : vector<8x128xf32>
    %15 = tpu.matmul %14, %2, %cst_10 {dimension_numbers = #tpu.dot_dimension_numbers<[1], [0], [0], [1], [0, 0, 1, 1], [], []>, precision = #tpu.contract_precision<fp32>} : vector<8x16xf32>, vector<16x128xf32>, vector<8x128xf32> -> vector<8x128xf32>
    %16 = arith.mulf %7, %15 : vector<8x128xf32>
    %c0_11 = arith.constant 0 : index
    %c0_12 = arith.constant 0 : index
    %17 = vector.load %arg2[%c0_11, %c0_12] : memref<1x128xf32, #tpu.memory_space<vmem>>, vector<1x128xf32>
    %18 = vector.broadcast %17 : vector<1x128xf32> to vector<8x128xf32>
    %19 = arith.mulf %16, %18 : vector<8x128xf32>
    %c0_13 = arith.constant 0 : index
    %c0_14 = arith.constant 0 : index
    %20 = vector.load %arg3[%c0_13, %c0_14] : memref<1x128xf32, #tpu.memory_space<vmem>>, vector<1x128xf32>
    %21 = vector.broadcast %20 : vector<1x128xf32> to vector<8x128xf32>
    %22 = arith.addf %19, %21 : vector<8x128xf32>
    %c0_15 = arith.constant 0 : index
    %c0_16 = arith.constant 0 : index
    %23 = vector.load %arg6[%c0_15, %c0_16] : memref<8x128xf32, #tpu.memory_space<vmem>>, vector<8x128xf32>
    tpu.vector_store %arg6[%c0_15, %c0_16], %22 {strides = array<i32>} : memref<8x128xf32, #tpu.memory_space<vmem>>, vector<8x128xf32>,
    return
  }
  func.func @transform_0(%arg0: i32) -> (i32, i32) {
    %c0_i32 = arith.constant 0 : i32
    %c0_i32_0 = arith.constant 0 : i32
    return %arg0, %c0_i32 : i32, i32
  }
  func.func @transform_1(%arg0: i32) -> (i32, i32) {
    %c0_i32 = arith.constant 0 : i32
    %c0_i32_0 = arith.constant 0 : i32
    %c0_i32_1 = arith.constant 0 : i32
    return %c0_i32, %c0_i32_0 : i32, i32
  }
  func.func @transform_2(%arg0: i32) -> (i32, i32) {
    %c0_i32 = arith.constant 0 : i32
    %c0_i32_0 = arith.constant 0 : i32
    %c0_i32_1 = arith.constant 0 : i32
    return %c0_i32, %c0_i32_0 : i32, i32
  }
  func.func @transform_3(%arg0: i32) -> (i32, i32) {
    %c0_i32 = arith.constant 0 : i32
    %c0_i32_0 = arith.constant 0 : i32
    %c0_i32_1 = arith.constant 0 : i32
    return %c0_i32, %c0_i32_0 : i32, i32
  }
  func.func @transform_4(%arg0: i32) -> (i32, i32) {
    %c0_i32 = arith.constant 0 : i32
    %c0_i32_0 = arith.constant 0 : i32
    %c0_i32_1 = arith.constant 0 : i32
    return %c0_i32, %c0_i32_0 : i32, i32
  }
  func.func @transform_5(%arg0: i32) -> (i32, i32) {
    %c0_i32 = arith.constant 0 : i32
    %c0_i32_0 = arith.constant 0 : i32
    return %arg0, %c0_i32 : i32, i32
  }
}

</mosaic_0001>

<bundles_post_ra>
// kernel: tpu_custom_call.1
= control target key start
LH: loop header
LB: loop body
LE: loop exit
PB: predicated region body
PF: predicated region fallthrough
CT: control target
= control target key end

     0   :  { %v3425_v3 = vmov 0.0|0.0   ;;  %vm3426_vm0 = vmmov 0   ;;  %v3427_v8 = vmov 0.0   ;;  %s3983_s0 = inlined_call_operand.vmem [shape: f32[8,128], index: 0, kind: input, shape index: {}]   ;;  %s3984_s1 = inlined_call_operand.vmem [shape: f32[1,128], index: 1, kind: input, shape index: {}]   ;;  %s3985_s2 = inlined_call_operand.vmem [shape: f32[1,128], index: 2, kind: input, shape index: {}]   ;;  %s3986_s3 = inlined_call_operand.vmem [shape: f32[128,16], index: 3, kind: input, shape index: {}]   ;;  %s3987_s4 = inlined_call_operand.vmem [shape: f32[16,128], index: 4, kind: input, shape index: {}]   ;;  %s3988_s5 = inlined_call_operand.hbm [shape: f32[8,128], index: 5, kind: output, shape index: {}]  }
   0x1   :  { %v22_v0 = vld [vmem:[%s3986_s3] sm:$0xff]  ;;  %v23_v1 = vld [vmem:[%s3986_s3 + $0x8] sm:$0xff]  ;;  %v24_v2 = vld [vmem:[%s3986_s3 + $0x10] sm:$0xff]  ;;  %3031 = vmatprep.subr.bf16.mxu0 %v3425_v3  ;;  %2559 = vmatprep.mubr.msk.f32.mxu0 %vm3426_vm0, %v3427_v8 }
   0x2   :  { %v41_v4 = vand.u32 4294901760, %v22_v0  ;;  %v44_v5 = vand.u32 4294901760, %v23_v1  ;;  %v25_v6 = vld [vmem:[%s3986_s3 + $0x18] sm:$0xff]  ;;  %v47_v7 = vand.u32 4294901760, %v24_v2  ;;  %v26_v10 = vld [vmem:[%s3986_s3 + $0x20] sm:$0xff]  ;;  %v27_v11 = vld [vmem:[%s3986_s3 + $0x28] sm:$0xff]  ;;  %3175 = vmatprep.subr.bf16.mxu1 %v3425_v3  ;;  %2741 = vmatprep.mubr.msk.f32.mxu1 %vm3426_vm0, %v3427_v8 }
   0x3   :  { %v50_v9 = vand.u32 4294901760, %v25_v6  ;;  %v53_v14 = vand.u32 4294901760, %v26_v10  ;;  %v56_v15 = vand.u32 4294901760, %v27_v11  ;;  %v28_v16 = vld [vmem:[%s3986_s3 + $0x30] sm:$0xff]  ;;  %v29_v17 = vld [vmem:[%s3986_s3 + $0x38] sm:$0xff] }
   0x4   :  { %v3483_v12 = vpack.c.bf16 %v44_v5, %v41_v4 }
   0x5   :  { %v3486_v13 = vpack.c.bf16 %v50_v9, %v47_v7 }
   0x6   :  { %3033 = vmatpush3.bf16.msra.mxu0 %v3483_v12 }
   0x7   :  { %3034 = vmatprep.subr.bf16.mxu0 %v3425_v3 }
   0x8   :  { %10 = vsyncpa [#allocation3], 0  ;;  %v3496_v18 = vpack.c.bf16 %v56_v15, %v53_v14  ;;  %v59_v19 = vand.u32 4294901760, %v28_v16  ;;  %v62_v20 = vand.u32 4294901760, %v29_v17  ;;  %v30_v21 = vld [vmem:[%s3986_s3 + $0x40] sm:$0xff]  ;;  %v31_v23 = vld [vmem:[%s3986_s3 + $0x48] sm:$0xff]  ;;  %v3534_v34 = vsub.f32 %v22_v0, %v41_v4 }
   0x9   :  { %v3504_v22 = vld [vmem:[%s3983_s0] sm:$0xff]  ;;  %v32_v24 = vld [vmem:[%s3986_s3 + $0x50] sm:$0xff]  ;;  %v33_v25 = vld [vmem:[%s3986_s3 + $0x58] sm:$0xff]  ;;  %v65_v27 = vand.u32 4294901760, %v30_v21  ;;  %v68_v33 = vand.u32 4294901760, %v31_v23  ;;  %v3536_v35 = vsub.f32 %v23_v1, %v44_v5  ;;  %v3543_v43 = vsub.f32 %v24_v2, %v47_v7  ;;  %s3428_s7 = smov [#allocation2]  }
   0xa   :  { %3036 = vmatpush3.bf16.msra.mxu0 %v3486_v13  ;;  %v34_v26 = vld [vmem:[%s3986_s3 + $0x60] sm:$0xff]  ;;  %v35_v28 = vld [vmem:[%s3986_s3 + $0x68] sm:$0xff]  ;;  %v36_v29 = vld [vmem:[%s3986_s3 + $0x70] sm:$0xff]  ;;  %v3529_v31 = vand.u32 4294901760, %v3504_v22  ;;  %v3532_v32 = vpack.c.bf16 %v62_v20, %v59_v19  ;;  %v71_v36 = vand.u32 4294901760, %v32_v24  ;;  %v74_v37 = vand.u32 4294901760, %v33_v25 }
   0xb   :  { %3037 = vmatprep.subr.bf16.mxu0 %v3425_v3  ;;  %v37_v30 = vld [vmem:[%s3986_s3 + $0x78] sm:$0xff]  ;;  %v77_v38 = vand.u32 4294901760, %v34_v26  ;;  %v80_v39 = vand.u32 4294901760, %v35_v28  ;;  %v83_v40 = vand.u32 4294901760, %v36_v29  ;;  %v3545_v44 = vsub.f32 %v25_v6, %v50_v9  ;;  %s2277_s8 = sshll.u32 %s3428_s7, 4  ;;  %s2278_s8 = int_to_ptr.vmem [resolvable:$true] %s2277_s8 }
   0xc   :  { %v86_v41 = vand.u32 4294901760, %v37_v30  ;;  %v3541_v42 = vsub.f32 %v3504_v22, %v3529_v31  ;;  %v3548_v45 = vpack.c.bf16 %v68_v33, %v65_v27  ;;  %v134_v46 = vand.u32 4294901760, %v3534_v34  ;;  %s3401_s9 = scalar_lea.vmem %s2278_s8, 128  ;;  %p3406_p1 = scmp.lt.s32.totalorder %s2278_s8, %s2278_s8 }
   0xd   :  { %v141_v47 = vand.u32 4294901760, %v3536_v35  ;;  %v3552_v48 = vsub.f32 %v26_v10, %v53_v14  ;;  %v3555_v49 = vpack.c.bf16 %v74_v37, %v71_v36  ;;  %v3557_v50 = vpack.c.bf16 %v80_v39, %v77_v38  ;;  %p3402_p0 = scmp.ne.s32.totalorder %s2278_s8, %s3401_s9  ;;  %p3407_p2 = scmp.lt.s32.totalorder %s3401_s9, %s3401_s9 }
   0xe   :  { %3039 = vmatpush3.bf16.msra.mxu0 %v3496_v18  ;;  %v3559_v51 = vpack.c.bf16 %v86_v41, %v83_v40  ;;  %v123_v52 = vand.u32 4294901760, %v3541_v42  ;;  %v148_v53 = vand.u32 4294901760, %v3543_v43  ;;  %v155_v54 = vand.u32 4294901760, %v3545_v44 }
   0xf   :  { %3040 = vmatprep.subr.bf16.mxu0 %v3425_v3  ;;  %v3564_v55 = vsub.f32 %v27_v11, %v56_v15  ;;  %v135_v56 = vsub.f32 %v3534_v34, %v134_v46  ;;  %v142_v57 = vsub.f32 %v3536_v35, %v141_v47  ;;  %v162_v58 = vand.u32 4294901760, %v3552_v48  ;;  %p3408_p3 = por %p3407_p2, %p3406_p1 }
  0x10   :  { %v3570_v59 = vsub.f32 %v28_v16, %v59_v19  ;;  %v3573_v60 = vsub.f32 %v29_v17, %v62_v20  ;;  %v3575_v61 = vsub.f32 %v30_v21, %v65_v27  ;;  %v3577_v62 = vsub.f32 %v31_v23, %v68_v33 }
  0x11   :  { %v3579_v63 = vsub.f32 %v32_v24, %v71_v36  ;;  %v3581_v0 = vsub.f32 %v33_v25, %v74_v37  ;;  %v3583_v1 = vsub.f32 %v34_v26, %v77_v38  ;;  %v3585_v2 = vsub.f32 %v35_v28, %v80_v39  ;;  %p3409_p4 = pnand %p3408_p3, %p3402_p0 }
  0x12   :  { %3042 = vmatpush3.bf16.msra.mxu0 %v3532_v32  ;;  %v3587_v4 = vsub.f32 %v36_v29, %v83_v40  ;;  %v124_v5 = vsub.f32 %v3541_v42, %v123_v52  ;;  %v149_v6 = vsub.f32 %v3543_v43, %v148_v53  ;;  %v169_v7 = vand.u32 4294901760, %v3564_v55 }
  0x13   :  { %3043 = vmatprep.subr.bf16.mxu0 %v3425_v3  ;;  %v3594_v9 = vsub.f32 %v37_v30, %v86_v41  ;;  %v136_v10 = vand.u32 4294901760, %v135_v56  ;;  %v143_v11 = vand.u32 4294901760, %v142_v57  ;;  %v156_v14 = vsub.f32 %v3545_v44, %v155_v54 }
  0x14   :  { %v176_v15 = vand.u32 4294901760, %v3570_v59  ;;  %v183_v16 = vand.u32 4294901760, %v3573_v60  ;;  %v190_v17 = vand.u32 4294901760, %v3575_v61  ;;  %v197_v19 = vand.u32 4294901760, %v3577_v62 }
  0x15   :  { %v204_v20 = vand.u32 4294901760, %v3579_v63  ;;  %v211_v21 = vand.u32 4294901760, %v3581_v0  ;;  %v218_v23 = vand.u32 4294901760, %v3583_v1  ;;  %v225_v24 = vand.u32 4294901760, %v3585_v2 }
  0x16   :  { %3045 = vmatpush3.bf16.msra.mxu0 %v3548_v45  ;;  %v232_v25 = vand.u32 4294901760, %v3587_v4  ;;  %v239_v26 = vand.u32 4294901760, %v3594_v9  ;;  %v3609_v27 = vpack.c.bf16 %v141_v47, %v134_v46  ;;  %v3611_v28 = vpack.c.bf16 %v155_v54, %v148_v53 }
  0x17   :  { %3046 = vmatprep.subr.bf16.mxu0 %v3425_v3  ;;  %v3613_v29 = vpack.c.bf16 %v169_v7, %v162_v58  ;;  %v3616_v30 = vpack.c.bf16 %v183_v16, %v176_v15  ;;  %v3618_v33 = vpack.c.bf16 %v197_v19, %v190_v17  ;;  %v3620_v36 = vpack.c.bf16 %v211_v21, %v204_v20 }
  0x18   :  { %v3622_v37 = vpack.c.bf16 %v225_v24, %v218_v23  ;;  %v3625_v38 = vpack.c.bf16 %v239_v26, %v232_v25  ;;  %v125_v39 = vand.u32 4294901760, %v124_v5  ;;  %v163_v40 = vsub.f32 %v3552_v48, %v162_v58 }
  0x19   :  { %v3629_v41 = vpack.c.bf16 %v143_v11, %v136_v10  ;;  %v150_v46 = vand.u32 4294901760, %v149_v6  ;;  %v157_v47 = vand.u32 4294901760, %v156_v14  ;;  %v170_v53 = vsub.f32 %v3564_v55, %v169_v7 }
  0x1a   :  { %3048 = vmatpush3.bf16.msra.mxu0 %v3555_v49  ;;  %v177_v54 = vsub.f32 %v3570_v59, %v176_v15  ;;  %v164_v57 = vand.u32 4294901760, %v163_v40  ;;  %v184_v58 = vsub.f32 %v3573_v60, %v183_v16  ;;  %v191_v11 = vsub.f32 %v3575_v61, %v190_v17 }
  0x1b   :  { %3049 = vmatprep.subr.bf16.mxu0 %v3425_v3  ;;  %v3635_v56 = vpack.c.bf16 %v157_v47, %v150_v46  ;;  %v171_v5 = vand.u32 4294901760, %v170_v53  ;;  %v198_v14 = vsub.f32 %v3577_v62, %v197_v19  ;;  %v205_v15 = vsub.f32 %v3579_v63, %v204_v20 }
  0x1c   :  { %v178_v6 = vand.u32 4294901760, %v177_v54  ;;  %v185_v10 = vand.u32 4294901760, %v184_v58  ;;  %v212_v46 = vsub.f32 %v3581_v0, %v211_v21  ;;  %v219_v47 = vsub.f32 %v3583_v1, %v218_v23 }
  0x1d   :  { %v3642_v7 = vpack.c.bf16 %v171_v5, %v164_v57  ;;  %v199_v40 = vand.u32 4294901760, %v198_v14  ;;  %v206_v19 = vand.u32 4294901760, %v205_v15  ;;  %v226_v20 = vsub.f32 %v3585_v2, %v225_v24 }
  0x1e   :  { %3051 = vmatpush3.bf16.msra.mxu0 %v3557_v50  ;;  %v3649_v16 = vpack.c.bf16 %v185_v10, %v178_v6  ;;  %v213_v53 = vand.u32 4294901760, %v212_v46  ;;  %v233_v54 = vsub.f32 %v3587_v4, %v232_v25  ;;  %v220_v21 = vand.u32 4294901760, %v219_v47 }
  0x1f   :  { %3052 = vmatprep.subr.bf16.mxu0 %v3425_v3  ;;  %v227_v5 = vand.u32 4294901760, %v226_v20  ;;  %v240_v23 = vsub.f32 %v3594_v9, %v239_v26  ;;  %v3676_v26 = vpack.c.bf16 %v3536_v35, %v3534_v34  ;;  %v3683_v10 = vpack.c.bf16 %v3545_v44, %v3543_v43 }
  0x20   :  { %v3661_v57 = vpack.c.bf16 %v213_v53, %v206_v19  ;;  %v234_v6 = vand.u32 4294901760, %v233_v54  ;;  %v3691_v34 = vpack.c.bf16 %v3564_v55, %v3552_v48  ;;  %v3697_v35 = vpack.c.bf16 %v3573_v60, %v3570_v59 }
  0x21   :  { %v3666_v58 = vpack.c.bf16 %v227_v5, %v220_v21  ;;  %v241_v24 = vand.u32 4294901760, %v240_v23  ;;  %v3703_v43 = vpack.c.bf16 %v3577_v62, %v3575_v61  ;;  %v3709_v44 = vpack.c.bf16 %v3581_v0, %v3579_v63 }
  0x22   :  { %3054 = vmatpush3.bf16.msra.mxu0 %v3559_v51  ;;  %v3715_v48 = vpack.c.bf16 %v3585_v2, %v3583_v1  ;;  %v3721_v55 = vpack.c.bf16 %v3594_v9, %v3587_v4  ;;  %vm682_vm1 = vcmask 130048  }
  0x23   :  { %3055 = vmatprep.subr.bf16.mxu0 %v3425_v3  ;;  %v3670_v25 = vpack.c.bf16 %v241_v24, %v234_v6 }
  0x25   :  { %2560 = vmatmul.mubr.f32.vlgmr.msra.gmra.mrb[0].mxu0 %v125_v39  ;;  %v192_v39 = vand.u32 4294901760, %v191_v11 }
  0x26   :  { %3057 = vmatpush3.bf16.msra.mxu0 %v3629_v41  ;;  %2594 = vmatprep.mubr.msk.f32.mxu0 %vm3426_vm0, %v3427_v8 }
  0x27   :  { %3058 = vmatprep.subr.bf16.mxu0 %v3425_v3  ;;  %v3655_v17 = vpack.c.bf16 %v199_v40, %v192_v39 }
  0x2a   :  { %3060 = vmatpush3.bf16.msra.mxu0 %v3635_v56 }
  0x2b   :  { %3061 = vmatprep.subr.bf16.mxu0 %v3425_v3 }
  0x2e   :  { %3063 = vmatpush3.bf16.msra.mxu0 %v3642_v7 }
  0x2f   :  { %3064 = vmatprep.subr.bf16.mxu0 %v3425_v3 }
  0x32   :  { %3066 = vmatpush3.bf16.msra.mxu0 %v3649_v16 }
  0x33   :  { %3067 = vmatprep.subr.bf16.mxu0 %v3425_v3 }
  0x36   :  { %3069 = vmatpush3.bf16.msra.mxu0 %v3655_v17 }
  0x37   :  { %3070 = vmatprep.subr.bf16.mxu0 %v3425_v3 }
  0x3a   :  { %3072 = vmatpush3.bf16.msra.mxu0 %v3661_v57 }
  0x3b   :  { %3073 = vmatprep.subr.bf16.mxu0 %v3425_v3 }
  0x3e   :  { %3075 = vmatpush3.bf16.msra.mxu0 %v3666_v58 }
  0x3f   :  { %3076 = vmatprep.subr.bf16.mxu0 %v3425_v3 }
  0x42   :  { %3078 = vmatpush3.bf16.msra.mxu0 %v3670_v25 }
  0x43   :  { %3079 = vmatprep.subr.bf16.mxu0 %v3425_v3 }
  0x45   :  { %2595 = vmatmul.mubr.f32.vlgmr.msra.gmra.mrb[0].mxu0 %v3529_v31 }
  0x46   :  { %3081 = vmatpush3.bf16.msra.mxu0 %v3676_v26  ;;  %2629 = vmatprep.mubr.msk.f32.mxu0 %vm3426_vm0, %v3427_v8 }
  0x47   :  { %3082 = vmatprep.subr.bf16.mxu0 %v3425_v3 }
  0x4a   :  { %3084 = vmatpush3.bf16.msra.mxu0 %v3683_v10 }
  0x4b   :  { %3085 = vmatprep.subr.bf16.mxu0 %v3425_v3 }
  0x4e   :  { %3087 = vmatpush3.bf16.msra.mxu0 %v3691_v34 }
  0x4f   :  { %3088 = vmatprep.subr.bf16.mxu0 %v3425_v3 }
  0x52   :  { %3090 = vmatpush3.bf16.msra.mxu0 %v3697_v35 }
  0x53   :  { %3091 = vmatprep.subr.bf16.mxu0 %v3425_v3 }
  0x56   :  { %3093 = vmatpush3.bf16.msra.mxu0 %v3703_v43 }
  0x57   :  { %3094 = vmatprep.subr.bf16.mxu0 %v3425_v3 }
  0x5a   :  { %3096 = vmatpush3.bf16.msra.mxu0 %v3709_v44 }
  0x5b   :  { %3097 = vmatprep.subr.bf16.mxu0 %v3425_v3 }
  0x5e   :  { %3099 = vmatpush3.bf16.msra.mxu0 %v3715_v48 }
  0x5f   :  { %3100 = vmatprep.subr.bf16.mxu0 %v3425_v3 }
  0x62   :  { %3102 = vmatpush3.bf16.msra.mxu0 %v3721_v55 }
  0x63   :  { %3103 = vmatprep.subr.bf16.mxu0 %v3425_v3 }
  0x65   :  { %2630 = vmatmul.mubr.f32.vlgmr.msra.gmra.mrb[0].mxu0 %v3541_v42  ;;  %v38_v42 = vld [vmem:[%s3987_s4] sm:$0xff] }
  0x66   :  { %3105 = vmatpush3.bf16.msra.mxu0 %v3483_v12  ;;  %2664 = vmatprep.mubr.msk.f32.mxu0 %vm3426_vm0, %v3427_v8  ;;  %v687_v59 = vand.u32 4294901760, %v38_v42 }
  0x67   :  { %3106 = vmatprep.subr.bf16.mxu0 %v3425_v3 }
  0x68   :  { %v765_v62 = vsub.f32 %v38_v42, %v687_v59 }
  0x6a   :  { %3108 = vmatpush3.bf16.msra.mxu0 %v3486_v13 }
  0x6b   :  { %3109 = vmatprep.subr.bf16.mxu0 %v3425_v3 }
  0x6e   :  { %3111 = vmatpush3.bf16.msra.mxu0 %v3496_v18 }
  0x6f   :  { %3112 = vmatprep.subr.bf16.mxu0 %v3425_v3 }
  0x72   :  { %3114 = vmatpush3.bf16.msra.mxu0 %v3532_v32 }
  0x73   :  { %3115 = vmatprep.subr.bf16.mxu0 %v3425_v3 }
  0x76   :  { %3117 = vmatpush3.bf16.msra.mxu0 %v3548_v45 }
  0x77   :  { %3118 = vmatprep.subr.bf16.mxu0 %v3425_v3 }
  0x7a   :  { %3120 = vmatpush3.bf16.msra.mxu0 %v3555_v49 }
  0x7b   :  { %3121 = vmatprep.subr.bf16.mxu0 %v3425_v3 }
  0x7e   :  { %3123 = vmatpush3.bf16.msra.mxu0 %v3557_v50 }
  0x7f   :  { %3124 = vmatprep.subr.bf16.mxu0 %v3425_v3 }
  0x82   :  { %3126 = vmatpush3.bf16.msra.mxu0 %v3559_v51 }
  0x83   :  { %3127 = vmatprep.subr.bf16.mxu0 %v3425_v3 }
  0x85   :  { %2665 = vmatmul.mubr.f32.vlgmr.msra.gmra.mrb[0].mxu0 %v123_v52  ;;  %v39_v52 = vld [vmem:[%s3987_s4 + $0x8] sm:$0xff] }
  0x86   :  { %3129 = vmatpush3.bf16.msra.mxu0 %v3609_v27  ;;  %2699 = vmatprep.mubr.msk.f32.mxu0 %vm3426_vm0, %v3427_v8  ;;  %v690_v60 = vand.u32 4294901760, %v39_v52 }
  0x87   :  { %3130 = vmatprep.subr.bf16.mxu0 %v3425_v3 }
  0x88   :  { %v3793_v61 = vpack.c.bf16 %v690_v60, %v687_v59  ;;  %v772_v63 = vsub.f32 %v39_v52, %v690_v60 }
  0x8a   :  { %3132 = vmatpush3.bf16.msra.mxu0 %v3611_v28  ;;  %3177 = vmatpush3.bf16.msra.mxu1 %v3793_v61  ;;  %v773_v0 = vand.u32 4294901760, %v772_v63  ;;  %v3801_v14 = vpack.c.bf16 %v772_v63, %v765_v62 }
  0x8b   :  { %3133 = vmatprep.subr.bf16.mxu0 %v3425_v3  ;;  %3178 = vmatprep.subr.bf16.mxu1 %v3425_v3 }
  0x8c   :  { %v774_v2 = vsub.f32 %v772_v63, %v773_v0 }
  0x8e   :  { %3135 = vmatpush3.bf16.msra.mxu0 %v3613_v29  ;;  %v775_v9 = vand.u32 4294901760, %v774_v2 }
  0x8f   :  { %3136 = vmatprep.subr.bf16.mxu0 %v3425_v3 }
  0x92   :  { %3138 = vmatpush3.bf16.msra.mxu0 %v3616_v30 }
  0x93   :  { %3139 = vmatprep.subr.bf16.mxu0 %v3425_v3 }
  0x96   :  { %3141 = vmatpush3.bf16.msra.mxu0 %v3618_v33 }
  0x97   :  { %3142 = vmatprep.subr.bf16.mxu0 %v3425_v3 }
  0x9a   :  { %3144 = vmatpush3.bf16.msra.mxu0 %v3620_v36 }
  0x9b   :  { %3145 = vmatprep.subr.bf16.mxu0 %v3425_v3 }
  0x9e   :  { %3147 = vmatpush3.bf16.msra.mxu0 %v3622_v37 }
  0x9f   :  { %3148 = vmatprep.subr.bf16.mxu0 %v3425_v3 }
  0xa2   :  { %3150 = vmatpush3.bf16.msra.mxu0 %v3625_v38 }
  0xa3   :  { %3151 = vmatprep.subr.bf16.mxu0 %v3425_v3 }
  0xa5   :  { %2700 = vmatmul.mubr.f32.vlgmr.msra.gmra.mrb[0].mxu0 %v3529_v31 }
  0xa6   :  { %3153 = vmatpush3.bf16.msra.mxu0 %v3483_v12  ;;  %2734 = vmatprep.mubr.msk.f32.mxu0 %vm3426_vm0, %v3427_v8 }
  0xa7   :  { %3154 = vmatprep.subr.bf16.mxu0 %v3425_v3 }
  0xaa   :  { %3156 = vmatpush3.bf16.msra.mxu0 %v3486_v13 }
  0xab   :  { %3157 = vmatprep.subr.bf16.mxu0 %v3425_v3 }
  0xae   :  { %3159 = vmatpush3.bf16.msra.mxu0 %v3496_v18 }
  0xaf   :  { %3160 = vmatprep.subr.bf16.mxu0 %v3425_v3 }
  0xb2   :  { %3162 = vmatpush3.bf16.msra.mxu0 %v3532_v32 }
  0xb3   :  { %3163 = vmatprep.subr.bf16.mxu0 %v3425_v3 }
  0xb6   :  { %3165 = vmatpush3.bf16.msra.mxu0 %v3548_v45 }
  0xb7   :  { %3166 = vmatprep.subr.bf16.mxu0 %v3425_v3 }
  0xba   :  { %3168 = vmatpush3.bf16.msra.mxu0 %v3555_v49 }
  0xbb   :  { %3169 = vmatprep.subr.bf16.mxu0 %v3425_v3 }
  0xbe   :  { %3171 = vmatpush3.bf16.msra.mxu0 %v3557_v50 }
  0xbf   :  { %3172 = vmatprep.subr.bf16.mxu0 %v3425_v3 }
  0xc2   :  { %3174 = vmatpush3.bf16.msra.mxu0 %v3559_v51 }
  0xc3   :  { %3337 = vmatprep.subr.bf16.mxu0 %v3425_v3 }
  0xc5   :  { %2735 = vmatmul.mubr.f32.vlgmr.msra.gmra.mrb[0].mxu0 %v3529_v31  ;;  %v766_v31 = vand.u32 4294901760, %v765_v62 }
  0xc6   :  { %2993 = vmatprep.mubr.msk.f32.mxu0 %vm3426_vm0, %v3427_v8  ;;  %3339 = vmatpush3.bf16.msra.mxu0 %v3793_v61 }
  0xc7   :  { %3340 = vmatprep.subr.bf16.mxu0 %v3425_v3  ;;  %v767_v1 = vsub.f32 %v765_v62, %v766_v31  ;;  %v3803_v15 = vpack.c.bf16 %v773_v0, %v766_v31 }
  0xc9   :  { %v768_v4 = vand.u32 4294901760, %v767_v1 }
  0xcb   :  { %v3799_v11 = vpack.c.bf16 %v775_v9, %v768_v4 }
 0x198   :  { %v677_v39 = vpop.f32.mrb[0].mxu0 }
 0x199   :  { %v681_v40 = vmul.f32 0.125, %v677_v39  ;;  %v2736_v46 = vpop.f32.mrb[1].mxu0 }
 0x19b   :  { %v684_v47 = vsel %vm682_vm1, %v681_v40, 0 }
 0x19c   :  { %v753_v19 = vand.u32 4294901760, %v684_v47 }
 0x19e   :  { %v754_v53 = vsub.f32 %v684_v47, %v753_v19 }
 0x1a0   :  { %v755_v20 = vand.u32 4294901760, %v754_v53 }
 0x1a2   :  { %v756_v54 = vsub.f32 %v754_v53, %v755_v20 }
 0x1a4   :  { %v757_v21 = vand.u32 4294901760, %v756_v54 }
 0x1a6   :  { %2742 = vmatmul.mubr.f32.vlgmr.msra.gmra.mrb[0].mxu1 %v757_v21 }
 0x1a7   :  { %3180 = vmatpush3.bf16.msra.mxu1 %v3799_v11  ;;  %2748 = vmatprep.mubr.msk.f32.mxu1 %vm3426_vm0, %v3427_v8 }
 0x1a8   :  { %3181 = vmatprep.subr.bf16.mxu1 %v3425_v3 }
 0x1ae   :  { %2749 = vmatmul.mubr.f32.vlgmr.msra.gmra.mrb[0].mxu1 %v753_v19 }
 0x1af   :  { %3183 = vmatpush3.bf16.msra.mxu1 %v3801_v14  ;;  %2755 = vmatprep.mubr.msk.f32.mxu1 %vm3426_vm0, %v3427_v8 }
 0x1b0   :  { %3184 = vmatprep.subr.bf16.mxu1 %v3425_v3 }
 0x1b6   :  { %2756 = vmatmul.mubr.f32.vlgmr.msra.gmra.mrb[0].mxu1 %v754_v53 }
 0x1b7   :  { %3186 = vmatpush3.bf16.msra.mxu1 %v3793_v61  ;;  %2762 = vmatprep.mubr.msk.f32.mxu1 %vm3426_vm0, %v3427_v8 }
 0x1b8   :  { %3187 = vmatprep.subr.bf16.mxu1 %v3425_v3 }
 0x1be   :  { %2763 = vmatmul.mubr.f32.vlgmr.msra.gmra.mrb[0].mxu1 %v755_v20 }
 0x1bf   :  { %3189 = vmatpush3.bf16.msra.mxu1 %v3803_v15  ;;  %2769 = vmatprep.mubr.msk.f32.mxu1 %vm3426_vm0, %v3427_v8 }
 0x1c0   :  { %3190 = vmatprep.subr.bf16.mxu1 %v3425_v3 }
 0x1c6   :  { %2770 = vmatmul.mubr.f32.vlgmr.msra.gmra.mrb[0].mxu1 %v753_v19 }
 0x1c7   :  { %3192 = vmatpush3.bf16.msra.mxu1 %v3793_v61  ;;  %2776 = vmatprep.mubr.msk.f32.mxu1 %vm3426_vm0, %v3427_v8 }
 0x1c8   :  { %3193 = vmatprep.subr.bf16.mxu1 %v3425_v3 }
 0x1ce   :  { %2777 = vmatmul.mubr.f32.vlgmr.msra.gmra.mrb[0].mxu1 %v753_v19 }
 0x1cf   :  { %3195 = vmatpush3.bf16.msra.mxu1 %v3483_v12  ;;  %2811 = vmatprep.mubr.msk.f32.mxu1 %vm3426_vm0, %v3427_v8 }
 0x1d0   :  { %3196 = vmatprep.subr.bf16.mxu1 %v3425_v3 }
 0x1d3   :  { %3198 = vmatpush3.bf16.msra.mxu1 %v3486_v13 }
 0x1d4   :  { %3199 = vmatprep.subr.bf16.mxu1 %v3425_v3 }
 0x1d7   :  { %3201 = vmatpush3.bf16.msra.mxu1 %v3496_v18 }
 0x1d8   :  { %3202 = vmatprep.subr.bf16.mxu1 %v3425_v3 }
 0x1db   :  { %3204 = vmatpush3.bf16.msra.mxu1 %v3532_v32 }
 0x1dc   :  { %3205 = vmatprep.subr.bf16.mxu1 %v3425_v3 }
 0x1df   :  { %3207 = vmatpush3.bf16.msra.mxu1 %v3548_v45 }
 0x1e0   :  { %3208 = vmatprep.subr.bf16.mxu1 %v3425_v3 }
 0x1e3   :  { %3210 = vmatpush3.bf16.msra.mxu1 %v3555_v49 }
 0x1e4   :  { %3211 = vmatprep.subr.bf16.mxu1 %v3425_v3 }
 0x1e7   :  { %3213 = vmatpush3.bf16.msra.mxu1 %v3557_v50 }
 0x1e8   :  { %3214 = vmatprep.subr.bf16.mxu1 %v3425_v3 }
 0x1eb   :  { %3216 = vmatpush3.bf16.msra.mxu1 %v3559_v51 }
 0x1ec   :  { %3217 = vmatprep.subr.bf16.mxu1 %v3425_v3 }
 0x2a1   :  { %v1141_v5 = vpop.f32.mrb[0].mxu1 }
 0x2a2   :  { %v3845_v23 = vsub.f32 %v3504_v22, %v1141_v5  ;;  %v2778_v6 = vpop.f32.mrb[1].mxu1 }
 0x2a4   :  { %v1146_v24 = vmul.f32 %v3845_v23, %v3845_v23 }
 0x2a6   :  { %v3849_v42 = vand.u32 4294901760, %v1146_v24 }
 0x2a8   :  { %v1229_v52 = vsub.f32 %v1146_v24, %v3849_v42 }
 0x2aa   :  { %v1230_v59 = vand.u32 4294901760, %v1229_v52 }
 0x2ac   :  { %v1231_v60 = vsub.f32 %v1229_v52, %v1230_v59 }
 0x2ae   :  { %v1232_v62 = vand.u32 4294901760, %v1231_v60 }
 0x2b0   :  { %2812 = vmatmul.mubr.f32.vlgmr.msra.gmra.mrb[2].mxu1 %v1232_v62 }
 0x2b1   :  { %3219 = vmatpush3.bf16.msra.mxu1 %v3629_v41  ;;  %2846 = vmatprep.mubr.msk.f32.mxu1 %vm3426_vm0, %v3427_v8 }
 0x2b2   :  { %3220 = vmatprep.subr.bf16.mxu1 %v3425_v3 }
 0x2b5   :  { %3222 = vmatpush3.bf16.msra.mxu1 %v3635_v56 }
 0x2b6   :  { %3223 = vmatprep.subr.bf16.mxu1 %v3425_v3 }
 0x2b9   :  { %3225 = vmatpush3.bf16.msra.mxu1 %v3642_v7 }
 0x2ba   :  { %3226 = vmatprep.subr.bf16.mxu1 %v3425_v3 }
 0x2bd   :  { %3228 = vmatpush3.bf16.msra.mxu1 %v3649_v16 }
 0x2be   :  { %3229 = vmatprep.subr.bf16.mxu1 %v3425_v3 }
 0x2c1   :  { %3231 = vmatpush3.bf16.msra.mxu1 %v3655_v17 }
 0x2c2   :  { %3232 = vmatprep.subr.bf16.mxu1 %v3425_v3 }
 0x2c5   :  { %3234 = vmatpush3.bf16.msra.mxu1 %v3661_v57 }
 0x2c6   :  { %3235 = vmatprep.subr.bf16.mxu1 %v3425_v3 }
 0x2c9   :  { %3237 = vmatpush3.bf16.msra.mxu1 %v3666_v58 }
 0x2ca   :  { %3238 = vmatprep.subr.bf16.mxu1 %v3425_v3 }
 0x2cd   :  { %3240 = vmatpush3.bf16.msra.mxu1 %v3670_v25 }
 0x2ce   :  { %3241 = vmatprep.subr.bf16.mxu1 %v3425_v3 }
 0x2d0   :  { %2847 = vmatmul.mubr.f32.vlgmr.msra.gmra.mrb[2].mxu1 %v3849_v42 }
 0x2d1   :  { %3243 = vmatpush3.bf16.msra.mxu1 %v3676_v26  ;;  %2881 = vmatprep.mubr.msk.f32.mxu1 %vm3426_vm0, %v3427_v8 }
 0x2d2   :  { %3244 = vmatprep.subr.bf16.mxu1 %v3425_v3 }
 0x2d5   :  { %3246 = vmatpush3.bf16.msra.mxu1 %v3683_v10 }
 0x2d6   :  { %3247 = vmatprep.subr.bf16.mxu1 %v3425_v3 }
 0x2d9   :  { %3249 = vmatpush3.bf16.msra.mxu1 %v3691_v34 }
 0x2da   :  { %3250 = vmatprep.subr.bf16.mxu1 %v3425_v3 }
 0x2dd   :  { %3252 = vmatpush3.bf16.msra.mxu1 %v3697_v35 }
 0x2de   :  { %3253 = vmatprep.subr.bf16.mxu1 %v3425_v3 }
 0x2e1   :  { %3255 = vmatpush3.bf16.msra.mxu1 %v3703_v43 }
 0x2e2   :  { %3256 = vmatprep.subr.bf16.mxu1 %v3425_v3 }
 0x2e5   :  { %3258 = vmatpush3.bf16.msra.mxu1 %v3709_v44 }
 0x2e6   :  { %3259 = vmatprep.subr.bf16.mxu1 %v3425_v3 }
 0x2e9   :  { %3261 = vmatpush3.bf16.msra.mxu1 %v3715_v48 }
 0x2ea   :  { %3262 = vmatprep.subr.bf16.mxu1 %v3425_v3 }
 0x2ed   :  { %3264 = vmatpush3.bf16.msra.mxu1 %v3721_v55 }
 0x2ee   :  { %3265 = vmatprep.subr.bf16.mxu1 %v3425_v3 }
 0x2f0   :  { %2882 = vmatmul.mubr.f32.vlgmr.msra.gmra.mrb[2].mxu1 %v1229_v52 }
 0x2f1   :  { %3267 = vmatpush3.bf16.msra.mxu1 %v3483_v12  ;;  %2916 = vmatprep.mubr.msk.f32.mxu1 %vm3426_vm0, %v3427_v8 }
 0x2f2   :  { %3268 = vmatprep.subr.bf16.mxu1 %v3425_v3 }
 0x2f5   :  { %3270 = vmatpush3.bf16.msra.mxu1 %v3486_v13 }
 0x2f6   :  { %3271 = vmatprep.subr.bf16.mxu1 %v3425_v3 }
 0x2f9   :  { %3273 = vmatpush3.bf16.msra.mxu1 %v3496_v18 }
 0x2fa   :  { %3274 = vmatprep.subr.bf16.mxu1 %v3425_v3 }
 0x2fd   :  { %3276 = vmatpush3.bf16.msra.mxu1 %v3532_v32 }
 0x2fe   :  { %3277 = vmatprep.subr.bf16.mxu1 %v3425_v3 }
 0x301   :  { %3279 = vmatpush3.bf16.msra.mxu1 %v3548_v45 }
 0x302   :  { %3280 = vmatprep.subr.bf16.mxu1 %v3425_v3 }
 0x305   :  { %3282 = vmatpush3.bf16.msra.mxu1 %v3555_v49 }
 0x306   :  { %3283 = vmatprep.subr.bf16.mxu1 %v3425_v3 }
 0x309   :  { %3285 = vmatpush3.bf16.msra.mxu1 %v3557_v50 }
 0x30a   :  { %3286 = vmatprep.subr.bf16.mxu1 %v3425_v3 }
 0x30d   :  { %3288 = vmatpush3.bf16.msra.mxu1 %v3559_v51 }
 0x30e   :  { %3289 = vmatprep.subr.bf16.mxu1 %v3425_v3 }
 0x310   :  { %2917 = vmatmul.mubr.f32.vlgmr.msra.gmra.mrb[2].mxu1 %v1230_v59 }
 0x311   :  { %3291 = vmatpush3.bf16.msra.mxu1 %v3609_v27  ;;  %2951 = vmatprep.mubr.msk.f32.mxu1 %vm3426_vm0, %v3427_v8 }
 0x312   :  { %3292 = vmatprep.subr.bf16.mxu1 %v3425_v3 }
 0x315   :  { %3294 = vmatpush3.bf16.msra.mxu1 %v3611_v28 }
 0x316   :  { %3295 = vmatprep.subr.bf16.mxu1 %v3425_v3 }
 0x319   :  { %3297 = vmatpush3.bf16.msra.mxu1 %v3613_v29 }
 0x31a   :  { %3298 = vmatprep.subr.bf16.mxu1 %v3425_v3 }
 0x31d   :  { %3300 = vmatpush3.bf16.msra.mxu1 %v3616_v30 }
 0x31e   :  { %3301 = vmatprep.subr.bf16.mxu1 %v3425_v3 }
 0x321   :  { %3303 = vmatpush3.bf16.msra.mxu1 %v3618_v33 }
 0x322   :  { %3304 = vmatprep.subr.bf16.mxu1 %v3425_v3 }
 0x325   :  { %3306 = vmatpush3.bf16.msra.mxu1 %v3620_v36 }
 0x326   :  { %3307 = vmatprep.subr.bf16.mxu1 %v3425_v3 }
 0x329   :  { %3309 = vmatpush3.bf16.msra.mxu1 %v3622_v37  ;;  %v2286_v37 = vld [vmem:[%s3985_s2] ss:$0 sm:$0xff] }
 0x32a   :  { %3310 = vmatprep.subr.bf16.mxu1 %v3425_v3 }
 0x32d   :  { %3312 = vmatpush3.bf16.msra.mxu1 %v3625_v38 }
 0x32e   :  { %3313 = vmatprep.subr.bf16.mxu1 %v3425_v3 }
 0x330   :  { %2952 = vmatmul.mubr.f32.vlgmr.msra.gmra.mrb[2].mxu1 %v3849_v42 }
 0x331   :  { %3315 = vmatpush3.bf16.msra.mxu1 %v3483_v12  ;;  %2986 = vmatprep.mubr.msk.f32.mxu1 %vm3426_vm0, %v3427_v8 }
 0x332   :  { %3316 = vmatprep.subr.bf16.mxu1 %v3425_v3 }
 0x335   :  { %3318 = vmatpush3.bf16.msra.mxu1 %v3486_v13 }
 0x336   :  { %3319 = vmatprep.subr.bf16.mxu1 %v3425_v3 }
 0x339   :  { %3321 = vmatpush3.bf16.msra.mxu1 %v3496_v18 }
 0x33a   :  { %3322 = vmatprep.subr.bf16.mxu1 %v3425_v3 }
 0x33d   :  { %3324 = vmatpush3.bf16.msra.mxu1 %v3532_v32 }
 0x33e   :  { %3325 = vmatprep.subr.bf16.mxu1 %v3425_v3 }
 0x341   :  { %3327 = vmatpush3.bf16.msra.mxu1 %v3548_v45 }
 0x342   :  { %3328 = vmatprep.subr.bf16.mxu1 %v3425_v3 }
 0x345   :  { %3330 = vmatpush3.bf16.msra.mxu1 %v3555_v49 }
 0x346   :  { %3331 = vmatprep.subr.bf16.mxu1 %v3425_v3 }
 0x349   :  { %3333 = vmatpush3.bf16.msra.mxu1 %v3557_v50 }
 0x34a   :  { %3334 = vmatprep.subr.bf16.mxu1 %v3425_v3 }
 0x34d   :  { %3336 = vmatpush3.bf16.msra.mxu1 %v3559_v51  ;;  %v2285_v51 = vld [vmem:[%s3984_s1] ss:$0 sm:$0xff] }
 0x350   :  { %2987 = vmatmul.mubr.f32.vlgmr.msra.gmra.mrb[2].mxu1 %v3849_v42 }
 0x423   :  { %v1784_v12 = vpop.f32.mrb[2].mxu1 }
 0x424   :  { %v1788_v13 = vmul.f32 0.125, %v1784_v12  ;;  %v2988_v18 = vpop.f32.mrb[3].mxu1 }
 0x426   :  { %v1789_v22 = vadd.f32 1e-05, %v1788_v13 }
 0x428   :  { %3399 = vrsqrt.f32 %v1789_v22 }
 0x432   :  { %v3400_v32 = vpop.eup %3399 }
 0x433   :  { %v1792_v45 = vsel %vm682_vm1, %v3400_v32, 0 }
 0x434   :  { %v1861_v27 = vand.u32 4294901760, %v1792_v45 }
 0x436   :  { %v1862_v49 = vsub.f32 %v1792_v45, %v1861_v27 }
 0x438   :  { %v1863_v28 = vand.u32 4294901760, %v1862_v49 }
 0x43a   :  { %v1864_v29 = vsub.f32 %v1862_v49, %v1863_v28 }
 0x43c   :  { %v1865_v30 = vand.u32 4294901760, %v1864_v29 }
 0x43e   :  { %2994 = vmatmul.mubr.f32.vlgmr.msra.gmra.mrb[2].mxu0 %v1865_v30 }
 0x43f   :  { %3342 = vmatpush3.bf16.msra.mxu0 %v3799_v11  ;;  %3000 = vmatprep.mubr.msk.f32.mxu0 %vm3426_vm0, %v3427_v8 }
 0x440   :  { %3343 = vmatprep.subr.bf16.mxu0 %v3425_v3 }
 0x446   :  { %3001 = vmatmul.mubr.f32.vlgmr.msra.gmra.mrb[2].mxu0 %v1861_v27 }
 0x447   :  { %3345 = vmatpush3.bf16.msra.mxu0 %v3801_v14  ;;  %3007 = vmatprep.mubr.msk.f32.mxu0 %vm3426_vm0, %v3427_v8 }
 0x448   :  { %3346 = vmatprep.subr.bf16.mxu0 %v3425_v3 }
 0x44e   :  { %3008 = vmatmul.mubr.f32.vlgmr.msra.gmra.mrb[2].mxu0 %v1862_v49 }
 0x44f   :  { %3348 = vmatpush3.bf16.msra.mxu0 %v3793_v61  ;;  %3014 = vmatprep.mubr.msk.f32.mxu0 %vm3426_vm0, %v3427_v8 }
 0x450   :  { %3349 = vmatprep.subr.bf16.mxu0 %v3425_v3 }
 0x456   :  { %3015 = vmatmul.mubr.f32.vlgmr.msra.gmra.mrb[2].mxu0 %v1863_v28 }
 0x457   :  { %3351 = vmatpush3.bf16.msra.mxu0 %v3803_v15  ;;  %3021 = vmatprep.mubr.msk.f32.mxu0 %vm3426_vm0, %v3427_v8 }
 0x458   :  { %3352 = vmatprep.subr.bf16.mxu0 %v3425_v3 }
 0x45e   :  { %3022 = vmatmul.mubr.f32.vlgmr.msra.gmra.mrb[2].mxu0 %v1861_v27 }
 0x45f   :  { %3354 = vmatpush3.bf16.msra.mxu0 %v3793_v61  ;;  %3028 = vmatprep.mubr.msk.f32.mxu0 %vm3426_vm0, %v3427_v8 }
 0x466   :  { %3029 = vmatmul.mubr.f32.vlgmr.msra.gmra.mrb[2].mxu0 %v1861_v27 }
 0x539   :  { %v2249_v50 = vpop.f32.mrb[2].mxu0 }
 0x53a   :  { %v2253_v33 = vmul.f32 %v2249_v50, %v3845_v23  ;;  %v3030_v36 = vpop.f32.mrb[3].mxu0 }
 0x53c   :  { %v2261_v3 = vmul.f32 %v2285_v51, %v2253_v33 }
 0x53e   :  { %v2269_v38 = vadd.f32 %v2286_v37, %v2261_v3 }
 0x540   :  { %2270 = vst [vmem:[#allocation2] sm:$0xff] %v2269_v38 }
 0x541   :  { %3412 = shalt.err (!%p3409_p4)
}
 0x542   :  { %s3413_s11 = scalar_lea.hbm %s3988_s5, 128 }
 0x543   :  { %p3414_p5 = scmp.ne.s32.totalorder %s3988_s5, %s3413_s11  ;;  %p3417_p6 = scmp.lt.u32.totalorder %s3413_s11, %s3988_s5 }
 0x545   :  { %p3419_p7 = pnand %p3417_p6, %p3414_p5 }
 0x547   :  { %3422 = shalt.err (!%p3419_p7)
}
 0x548   :  { %2280 = dma.vmem_to_hbm [thread:$0]  %s2278_s8, 128, %s3988_s5, [#allocation3]  }
 0x549   :  { %3423 = dma.done.wait [#allocation3], 128  }
 0x54a   :  { %3424 = vsyncadd [#allocation3], 4294967168 }
 0x54b   :  { %2284 = vsyncpa [#allocation3], 1 }

</bundles_post_ra>
